<compile_context>
chip_gen: v5e
topology: v5e:2x2
jax: 0.10.0
libtpu: 0.0.40
codegen_flags: <defaults>
</compile_context>

<pallas_src>
import jax
import jax.numpy as jnp
from jax.experimental import pallas as pl
from jax.experimental.pallas import tpu as pltpu


def _round_up(x, m):
    return ((x + m - 1) // m) * m


def _dim_tiles(D, L):
    """Static tile sizes for the feature (D) and latent (L) dims."""
    Lp = _round_up(L, 128)                 # lane-dense latent
    td = min(512, _round_up(D, 128))       # 128..512-lane D tiles (VMEM-safe)
    Dp = _round_up(D, td)
    return td, Dp, Lp


# -----------------------------------------------------------------------------
# Kernel 1: encoder projection (K-reduction) + fused fc1||fc2 + reparameterize
# -----------------------------------------------------------------------------
def _enc_latent_kernel(x_ref, we_ref, be_ref, w12_ref, b12_ref, eps_ref,
                       z_ref, ml_ref, h_acc):
    k = pl.program_id(1)

    @pl.when(k == 0)
    def _():
        h_acc[...] = jnp.zeros_like(h_acc)

    # encoder stand-in projection: accumulate (tb, td)@(td, Lp) in f32 (MXU bf16)
    h_acc[...] += jnp.dot(x_ref[...], we_ref[...],
                          preferred_element_type=jnp.float32)

    @pl.when(k == pl.num_programs(1) - 1)
    def _():
        lp = z_ref.shape[-1]
        h = h_acc[...] + be_ref[...]                       # f32 VPU
        # fused fc1 || fc2: one (tb, Lp) @ (Lp, 2Lp) matmul
        ml = jnp.dot(h, w12_ref[...],
                     preferred_element_type=jnp.float32) + b12_ref[...]
        mu = ml[:, :lp]
        logvar = ml[:, lp:]
        # reparameterize (training mode): z = eps * exp(0.5*logvar) + mu  (f32)
        z = eps_ref[...] * jnp.exp(0.5 * logvar) + mu
        z_ref[...] = z.astype(z_ref.dtype)                 # bf16 feed for MXU
        ml_ref[...] = ml.astype(ml_ref.dtype)              # lane-dense slab


# -----------------------------------------------------------------------------
# Kernel 2: decoder projection, N-tiled over D
# -----------------------------------------------------------------------------
def _decoder_kernel(z_ref, wd_ref, bd_ref, o_ref):
    o_ref[...] = (jnp.dot(z_ref[...], wd_ref[...],
                          preferred_element_type=jnp.float32)
                  + bd_ref[...]).astype(o_ref.dtype)


# -----------------------------------------------------------------------------
# Parameter packing: pad to tile boundaries, fuse fc1/fc2, cast big weights bf16
# -----------------------------------------------------------------------------
def pack_params(params):
    D, L = params["we"].shape
    td, Dp, Lp = _dim_tiles(D, L)

    we = jnp.zeros((Dp, Lp), jnp.bfloat16)
    we = we.at[:D, :L].set(params["we"].astype(jnp.bfloat16))
    be = jnp.zeros((1, Lp), jnp.float32).at[:, :L].set(params["be"])

    # fc1 || fc2 fused: x @ [w1 | w2] + [b1 | b2]   (kept f32; small matmul)
    # NOTE: for very large latent sizes w12 should also be bf16 / tiled.
    w12 = jnp.zeros((Lp, 2 * Lp), jnp.float32)
    w12 = w12.at[:L, :L].set(params["w1"]).at[:L, Lp:Lp + L].set(params["w2"])
    b12 = jnp.zeros((1, 2 * Lp), jnp.float32)
    b12 = b12.at[:, :L].set(params["b1"]).at[:, Lp:Lp + L].set(params["b2"])

    wd = jnp.zeros((Lp, Dp), jnp.bfloat16)
    wd = wd.at[:L, :D].set(params["wd"].astype(jnp.bfloat16))
    bd = jnp.zeros((1, Dp), jnp.float32).at[:, :D].set(params["bd"])

    return {"we": we, "be": be, "w12": w12, "b12": b12, "wd": wd, "bd": bd}


# -----------------------------------------------------------------------------
# Forward pass
# -----------------------------------------------------------------------------
def conv_vae_forward(x, eps, packed):
    """x: (B, C, H, W) NCHW, eps: (B, latent). Returns (recon, mu, logvar)."""
    B, C, H, W = x.shape
    D = C * H * W
    L = eps.shape[1]
    td, Dp, Lp = _dim_tiles(D, L)
    tb = min(128, _round_up(B, 8))
    Bp = _round_up(B, tb)
    n_b, n_d = Bp // tb, Dp // td

    # Flatten glue + pad to tile boundaries; bf16 activations for the MXU dots.
    x_p = jnp.zeros((Bp, Dp), jnp.bfloat16)
    x_p = x_p.at[:B, :D].set(x.reshape(B, D).astype(jnp.bfloat16))
    eps_p = jnp.zeros((Bp, Lp), jnp.float32).at[:B, :L].set(eps)

    # ---- kernel 1: encoder projection + fc1||fc2 + reparameterize ----
    z, ml = pl.pallas_call(
        _enc_latent_kernel,
        out_shape=(jax.ShapeDtypeStruct((Bp, Lp), jnp.bfloat16),
                   jax.ShapeDtypeStruct((Bp, 2 * Lp), jnp.float32)),
        grid_spec=pltpu.PrefetchScalarGridSpec(
            num_scalar_prefetch=0,
            grid=(n_b, n_d),                       # K-reduction axis last
            in_specs=[
                pl.BlockSpec((tb, td), lambda i, k: (i, k)),       # x
                pl.BlockSpec((td, Lp), lambda i, k: (k, 0)),       # we (bf16)
                pl.BlockSpec((1, Lp), lambda i, k: (0, 0)),        # be
                pl.BlockSpec((Lp, 2 * Lp), lambda i, k: (0, 0)),   # w12
                pl.BlockSpec((1, 2 * Lp), lambda i, k: (0, 0)),    # b12
                pl.BlockSpec((tb, Lp), lambda i, k: (i, 0)),       # eps
            ],
            out_specs=(
                pl.BlockSpec((tb, Lp), lambda i, k: (i, 0)),       # z
                pl.BlockSpec((tb, 2 * Lp), lambda i, k: (i, 0)),   # mu||logvar
            ),
            scratch_shapes=[pltpu.VMEM((tb, Lp), jnp.float32)],    # h acc
        ),
        compiler_params=pltpu.CompilerParams(
            dimension_semantics=("parallel", "arbitrary")),
    )(x_p, packed["we"], packed["be"], packed["w12"], packed["b12"], eps_p)

    # ---- kernel 2: decoder projection, output N-tiled over D ----
    out_p = pl.pallas_call(
        _decoder_kernel,
        out_shape=jax.ShapeDtypeStruct((Bp, Dp), jnp.float32),
        grid_spec=pltpu.PrefetchScalarGridSpec(
            num_scalar_prefetch=0,
            grid=(n_b, n_d),
            in_specs=[
                pl.BlockSpec((tb, Lp), lambda i, j: (i, 0)),       # z (bf16)
                pl.BlockSpec((Lp, td), lambda i, j: (0, j)),       # wd (bf16)
                pl.BlockSpec((1, td), lambda i, j: (0, j)),        # bd
            ],
            out_specs=pl.BlockSpec((tb, td), lambda i, j: (i, j)),
        ),
        compiler_params=pltpu.CompilerParams(
            dimension_semantics=("parallel", "parallel")),
    )(z, packed["wd"], packed["bd"])

    # Unflatten glue + strip padding.
    recon = out_p[:B, :D].reshape(B, C, H, W)
    mu = ml[:B, :L]
    logvar = ml[:B, Lp:Lp + L]
    return recon, mu, logvar


def init_params(key, in_features, latent_size):
    """Deterministic parameter init. Linear weights stored as (in, out)."""
    ks = jax.random.split(key, 8)
    s_enc = 1.0 / jnp.sqrt(in_features)
    s_lat = 1.0 / jnp.sqrt(latent_size)
    return {
        "we": jax.random.uniform(ks[0], (in_features, latent_size),
                                 jnp.float32, -s_enc, s_enc),
        "be": jax.random.uniform(ks[1], (1, latent_size),
                                 jnp.float32, -s_enc, s_enc),
        "w1": jax.random.uniform(ks[2], (latent_size, latent_size),
                                 jnp.float32, -s_lat, s_lat),
        "b1": jax.random.uniform(ks[3], (1, latent_size),
                                 jnp.float32, -s_lat, s_lat),
        "w2": jax.random.uniform(ks[4], (latent_size, latent_size),
                                 jnp.float32, -s_lat, s_lat),
        "b2": jax.random.uniform(ks[5], (1, latent_size),
                                 jnp.float32, -s_lat, s_lat),
        "wd": jax.random.uniform(ks[6], (latent_size, in_features),
                                 jnp.float32, -s_lat, s_lat),
        "bd": jax.random.uniform(ks[7], (1, in_features),
                                 jnp.float32, -s_lat, s_lat),
    }


if __name__ == "__main__":
    # Small shapes consistent with the module: NCHW input with C=1
    # (ConvVAE.summary uses (1, input_size, input_size)), latent_size scaled down.
    B, C, H, W = 2, 1, 16, 16
    LATENT = 32

    key = jax.random.PRNGKey(0)
    k_x, k_eps, k_p = jax.random.split(key, 3)

    x = jax.random.normal(k_x, (B, C, H, W), jnp.float32)
    # training-mode reparameterize noise, torch.randn_like(std) equivalent
    eps = jax.random.normal(k_eps, (B, LATENT), jnp.float32)
    params = init_params(k_p, C * H * W, LATENT)
    packed = pack_params(params)

    fwd = jax.jit(conv_vae_forward)
    recon, mu, logvar = fwd(x, eps, packed)
    jax.block_until_ready((recon, mu, logvar))

    assert recon.shape == (B, C, H, W)
    assert mu.shape == (B, LATENT) and logvar.shape == (B, LATENT)
    print("KERNEL_OK")
</pallas_src>

<mosaic_0001>
module attributes {stable_mosaic.version = 11 : i64} {
  func.func @_enc_latent_kernel(%arg0: i32, %arg1: i32, %arg2: memref<8x256xbf16, #tpu.memory_space<vmem>>, %arg3: memref<256x128xbf16, #tpu.memory_space<vmem>>, %arg4: memref<1x128xf32, #tpu.memory_space<vmem>>, %arg5: memref<128x256xf32, #tpu.memory_space<vmem>>, %arg6: memref<1x256xf32, #tpu.memory_space<vmem>>, %arg7: memref<8x128xf32, #tpu.memory_space<vmem>>, %arg8: memref<8x128xbf16, #tpu.memory_space<vmem>>, %arg9: memref<8x256xf32, #tpu.memory_space<vmem>>, %arg10: memref<8x128xf32, #tpu.memory_space<vmem>>) attributes {dimension_semantics = [#tpu.dimension_semantics<parallel>, #tpu.dimension_semantics<arbitrary>], iteration_bounds = array<i64: 1, 1>, scalar_prefetch = 0 : i64, scratch_operands = 1 : i64, tpu.core_type = #tpu.core_type<tc>, window_params = [{transform_indices = @transform_0, window_bounds = array<i64: 8, 256>}, {transform_indices = @transform_1, window_bounds = array<i64: 256, 128>}, {pipeline_mode = #tpu.pipeline_mode<synchronous>, transform_indices = @transform_2, window_bounds = array<i64: 1, 128>}, {pipeline_mode = #tpu.pipeline_mode<synchronous>, transform_indices = @transform_3, window_bounds = array<i64: 128, 256>}, {pipeline_mode = #tpu.pipeline_mode<synchronous>, transform_indices = @transform_4, window_bounds = array<i64: 1, 256>}, {transform_indices = @transform_5, window_bounds = array<i64: 8, 128>}, {transform_indices = @transform_6, window_bounds = array<i64: 8, 128>}, {transform_indices = @transform_7, window_bounds = array<i64: 8, 256>}]} {
    %c0_i32 = arith.constant 0 : i32
    %0 = arith.cmpi eq, %arg1, %c0_i32 : i32
    %1 = arith.extui %0 : i1 to i32
    %c0_i32_0 = arith.constant 0 : i32
    %2 = arith.cmpi ne, %1, %c0_i32_0 : i32
    scf.if %2 {
      %cst_10 = arith.constant 0.000000e+00 : f32
      %12 = vector.broadcast %cst_10 : f32 to vector<8x128xf32>
      %c0_11 = arith.constant 0 : index
      %c0_12 = arith.constant 0 : index
      %13 = vector.load %arg10[%c0_11, %c0_12] : memref<8x128xf32, #tpu.memory_space<vmem>>, vector<8x128xf32>
      tpu.vector_store %arg10[%c0_11, %c0_12], %12 {strides = array<i32>} : memref<8x128xf32, #tpu.memory_space<vmem>>, vector<8x128xf32>,
    } else {
    }
    %c0 = arith.constant 0 : index
    %c0_1 = arith.constant 0 : index
    %3 = vector.load %arg10[%c0, %c0_1] : memref<8x128xf32, #tpu.memory_space<vmem>>, vector<8x128xf32>
    %c0_2 = arith.constant 0 : index
    %c0_3 = arith.constant 0 : index
    %4 = vector.load %arg2[%c0_2, %c0_3] : memref<8x256xbf16, #tpu.memory_space<vmem>>, vector<8x256xbf16>
    %c0_4 = arith.constant 0 : index
    %c0_5 = arith.constant 0 : index
    %5 = vector.load %arg3[%c0_4, %c0_5] : memref<256x128xbf16, #tpu.memory_space<vmem>>, vector<256x128xbf16>
    %cst = arith.constant dense<0.000000e+00> : vector<8x128xf32>
    %6 = tpu.matmul %4, %5, %cst {dimension_numbers = #tpu.dot_dimension_numbers<[1], [0], [0], [1], [0, 0, 1, 1], [], []>} : vector<8x256xbf16>, vector<256x128xbf16>, vector<8x128xf32> -> vector<8x128xf32>
    %7 = arith.addf %3, %6 : vector<8x128xf32>
    %c0_6 = arith.constant 0 : index
    %c0_7 = arith.constant 0 : index
    %8 = vector.load %arg10[%c0_6, %c0_7] : memref<8x128xf32, #tpu.memory_space<vmem>>, vector<8x128xf32>
    tpu.vector_store %arg10[%c0_6, %c0_7], %7 {strides = array<i32>} : memref<8x128xf32, #tpu.memory_space<vmem>>, vector<8x128xf32>,
    %c0_i32_8 = arith.constant 0 : i32
    %9 = arith.cmpi eq, %arg1, %c0_i32_8 : i32
    %10 = arith.extui %9 : i1 to i32
    %c0_i32_9 = arith.constant 0 : i32
    %11 = arith.cmpi ne, %10, %c0_i32_9 : i32
    scf.if %11 {
      %c0_10 = arith.constant 0 : index
      %c0_11 = arith.constant 0 : index
      %12 = vector.load %arg10[%c0_10, %c0_11] : memref<8x128xf32, #tpu.memory_space<vmem>>, vector<8x128xf32>
      %c0_12 = arith.constant 0 : index
      %c0_13 = arith.constant 0 : index
      %13 = vector.load %arg4[%c0_12, %c0_13] : memref<1x128xf32, #tpu.memory_space<vmem>>, vector<1x128xf32>
      %14 = vector.broadcast %13 : vector<1x128xf32> to vector<8x128xf32>
      %15 = arith.addf %12, %14 : vector<8x128xf32>
      %c0_14 = arith.constant 0 : index
      %c0_15 = arith.constant 0 : index
      %16 = vector.load %arg5[%c0_14, %c0_15] : memref<128x256xf32, #tpu.memory_space<vmem>>, vector<128x256xf32>
      %cst_16 = arith.constant dense<0.000000e+00> : vector<8x256xf32>
      %17 = tpu.matmul %15, %16, %cst_16 {dimension_numbers = #tpu.dot_dimension_numbers<[1], [0], [0], [1], [0, 0, 1, 1], [], []>} : vector<8x128xf32>, vector<128x256xf32>, vector<8x256xf32> -> vector<8x256xf32>
      %c0_17 = arith.constant 0 : index
      %c0_18 = arith.constant 0 : index
      %18 = vector.load %arg6[%c0_17, %c0_18] : memref<1x256xf32, #tpu.memory_space<vmem>>, vector<1x256xf32>
      %19 = vector.broadcast %18 : vector<1x256xf32> to vector<8x256xf32>
      %20 = arith.addf %17, %19 : vector<8x256xf32>
      %21 = vector.extract_strided_slice %20 {offsets = [0, 0], sizes = [8, 128], strides = [1, 1]} : vector<8x256xf32> to vector<8x128xf32>
      %22 = vector.extract_strided_slice %20 {offsets = [0, 128], sizes = [8, 128], strides = [1, 1]} : vector<8x256xf32> to vector<8x128xf32>
      %c0_19 = arith.constant 0 : index
      %c0_20 = arith.constant 0 : index
      %23 = vector.load %arg7[%c0_19, %c0_20] : memref<8x128xf32, #tpu.memory_space<vmem>>, vector<8x128xf32>
      %cst_21 = arith.constant 5.000000e-01 : f32
      %24 = vector.broadcast %cst_21 : f32 to vector<8x128xf32>
      %25 = arith.mulf %24, %22 : vector<8x128xf32>
      %26 = math.exp %25 : vector<8x128xf32>
      %27 = arith.mulf %23, %26 : vector<8x128xf32>
      %28 = arith.addf %27, %21 : vector<8x128xf32>
      %29 = arith.truncf %28 : vector<8x128xf32> to vector<8x128xbf16>
      %c0_22 = arith.constant 0 : index
      %c0_23 = arith.constant 0 : index
      %30 = vector.load %arg8[%c0_22, %c0_23] : memref<8x128xbf16, #tpu.memory_space<vmem>>, vector<8x128xbf16>
      tpu.vector_store %arg8[%c0_22, %c0_23], %29 {strides = array<i32>} : memref<8x128xbf16, #tpu.memory_space<vmem>>, vector<8x128xbf16>,
      %c0_24 = arith.constant 0 : index
      %c0_25 = arith.constant 0 : index
      %31 = vector.load %arg9[%c0_24, %c0_25] : memref<8x256xf32, #tpu.memory_space<vmem>>, vector<8x256xf32>
      tpu.vector_store %arg9[%c0_24, %c0_25], %20 {strides = array<i32>} : memref<8x256xf32, #tpu.memory_space<vmem>>, vector<8x256xf32>,
    } else {
    }
    return
  }
  func.func @transform_0(%arg0: i32, %arg1: i32) -> (i32, i32) {
    %c0_i32 = arith.constant 0 : i32
    return %arg0, %arg1 : i32, i32
  }
  func.func @transform_1(%arg0: i32, %arg1: i32) -> (i32, i32) {
    %c0_i32 = arith.constant 0 : i32
    %c0_i32_0 = arith.constant 0 : i32
    return %arg1, %c0_i32 : i32, i32
  }
  func.func @transform_2(%arg0: i32, %arg1: i32) -> (i32, i32) {
    %c0_i32 = arith.constant 0 : i32
    %c0_i32_0 = arith.constant 0 : i32
    %c0_i32_1 = arith.constant 0 : i32
    return %c0_i32, %c0_i32_0 : i32, i32
  }
  func.func @transform_3(%arg0: i32, %arg1: i32) -> (i32, i32) {
    %c0_i32 = arith.constant 0 : i32
    %c0_i32_0 = arith.constant 0 : i32
    %c0_i32_1 = arith.constant 0 : i32
    return %c0_i32, %c0_i32_0 : i32, i32
  }
  func.func @transform_4(%arg0: i32, %arg1: i32) -> (i32, i32) {
    %c0_i32 = arith.constant 0 : i32
    %c0_i32_0 = arith.constant 0 : i32
    %c0_i32_1 = arith.constant 0 : i32
    return %c0_i32, %c0_i32_0 : i32, i32
  }
  func.func @transform_5(%arg0: i32, %arg1: i32) -> (i32, i32) {
    %c0_i32 = arith.constant 0 : i32
    %c0_i32_0 = arith.constant 0 : i32
    return %arg0, %c0_i32 : i32, i32
  }
  func.func @transform_6(%arg0: i32, %arg1: i32) -> (i32, i32) {
    %c0_i32 = arith.constant 0 : i32
    %c0_i32_0 = arith.constant 0 : i32
    return %arg0, %c0_i32 : i32, i32
  }
  func.func @transform_7(%arg0: i32, %arg1: i32) -> (i32, i32) {
    %c0_i32 = arith.constant 0 : i32
    %c0_i32_0 = arith.constant 0 : i32
    return %arg0, %c0_i32 : i32, i32
  }
}

module attributes {stable_mosaic.version = 11 : i64} {
  func.func @_decoder_kernel(%arg0: i32, %arg1: i32, %arg2: memref<8x128xbf16, #tpu.memory_space<vmem>>, %arg3: memref<128x256xbf16, #tpu.memory_space<vmem>>, %arg4: memref<1x256xf32, #tpu.memory_space<vmem>>, %arg5: memref<8x256xf32, #tpu.memory_space<vmem>>) attributes {dimension_semantics = [#tpu.dimension_semantics<parallel>, #tpu.dimension_semantics<parallel>], iteration_bounds = array<i64: 1, 1>, scalar_prefetch = 0 : i64, scratch_operands = 0 : i64, tpu.core_type = #tpu.core_type<tc>, window_params = [{transform_indices = @transform_0, window_bounds = array<i64: 8, 128>}, {transform_indices = @transform_1, window_bounds = array<i64: 128, 256>}, {transform_indices = @transform_2, window_bounds = array<i64: 1, 256>}, {transform_indices = @transform_3, window_bounds = array<i64: 8, 256>}]} {
    %c0 = arith.constant 0 : index
    %c0_0 = arith.constant 0 : index
    %0 = vector.load %arg2[%c0, %c0_0] : memref<8x128xbf16, #tpu.memory_space<vmem>>, vector<8x128xbf16>
    %c0_1 = arith.constant 0 : index
    %c0_2 = arith.constant 0 : index
    %1 = vector.load %arg3[%c0_1, %c0_2] : memref<128x256xbf16, #tpu.memory_space<vmem>>, vector<128x256xbf16>
    %cst = arith.constant dense<0.000000e+00> : vector<8x256xf32>
    %2 = tpu.matmul %0, %1, %cst {dimension_numbers = #tpu.dot_dimension_numbers<[1], [0], [0], [1], [0, 0, 1, 1], [], []>} : vector<8x128xbf16>, vector<128x256xbf16>, vector<8x256xf32> -> vector<8x256xf32>
    %c0_3 = arith.constant 0 : index
    %c0_4 = arith.constant 0 : index
    %3 = vector.load %arg4[%c0_3, %c0_4] : memref<1x256xf32, #tpu.memory_space<vmem>>, vector<1x256xf32>
    %4 = vector.broadcast %3 : vector<1x256xf32> to vector<8x256xf32>
    %5 = arith.addf %2, %4 : vector<8x256xf32>
    %c0_5 = arith.constant 0 : index
    %c0_6 = arith.constant 0 : index
    %6 = vector.load %arg5[%c0_5, %c0_6] : memref<8x256xf32, #tpu.memory_space<vmem>>, vector<8x256xf32>
    tpu.vector_store %arg5[%c0_5, %c0_6], %5 {strides = array<i32>} : memref<8x256xf32, #tpu.memory_space<vmem>>, vector<8x256xf32>,
    return
  }
  func.func @transform_0(%arg0: i32, %arg1: i32) -> (i32, i32) {
    %c0_i32 = arith.constant 0 : i32
    %c0_i32_0 = arith.constant 0 : i32
    return %arg0, %c0_i32 : i32, i32
  }
  func.func @transform_1(%arg0: i32, %arg1: i32) -> (i32, i32) {
    %c0_i32 = arith.constant 0 : i32
    %c0_i32_0 = arith.constant 0 : i32
    return %c0_i32, %arg1 : i32, i32
  }
  func.func @transform_2(%arg0: i32, %arg1: i32) -> (i32, i32) {
    %c0_i32 = arith.constant 0 : i32
    %c0_i32_0 = arith.constant 0 : i32
    return %c0_i32, %arg1 : i32, i32
  }
  func.func @transform_3(%arg0: i32, %arg1: i32) -> (i32, i32) {
    %c0_i32 = arith.constant 0 : i32
    return %arg0, %arg1 : i32, i32
  }
}

</mosaic_0001>

<bundles_post_ra>
// kernel: conv_vae_forward.3
= control target key start
LH: loop header
LB: loop body
LE: loop exit
PB: predicated region body
PF: predicated region fallthrough
CT: control target
= control target key end

     0   :  { %8 = vsyncpa [#allocation3], 0  ;;  %s275_s15 = smov [#allocation2]   ;;  %s276_s17 = smov 128   ;;  %s313_s0 = inlined_call_operand.vmem [shape: bf16[8,128], index: 0, kind: input, shape index: {}]   ;;  %s314_s1 = inlined_call_operand.hbm [shape: bf16[128,256], index: 1, kind: input, shape index: {}]   ;;  %s315_s2 = inlined_call_operand.vmem [shape: f32[1,256], index: 2, kind: input, shape index: {}]   ;;  %s316_s3 = inlined_call_operand.vmem [shape: f32[8,256], index: 3, kind: output, shape index: {}]  }
   0x1   :  { %s15_s14 = sshll.u32 %s314_s1, 4  ;;  %s17_s16 = sshll.u32 %s275_s15, 4  ;;  %s16_s14 = int_to_ptr.hbm [resolvable:$true] %s15_s14  ;;  %s18_s16 = int_to_ptr.vmem [resolvable:$true] %s17_s16 }
   0x2   :  { %s277_s18 = smov 8  }
   0x3   :  { %23 = dma.hbm_to_vmem [thread:$0]  %s16_s14, 2048, %s18_s16, [#allocation3], %s276_s17, %s276_s17, %s277_s18  }
   0x4   :  { %273 = dma.done.wait [#allocation3], 2048  }
   0x5   :  { %274 = vsyncadd [#allocation3], 4294965248  ;;  %v224_v0 = vld [vmem:[#allocation2 + $0x70] sm:$0xf]  ;;  %v245_v1 = vld [vmem:[#allocation2 + $0x74] sm:$0xf0] }
   0x6   :  { %v244_v2 = vld [vmem:[#allocation2 + $0x74] sm:$0xf]  ;;  %v225_v3 = vor.u32 %v245_v1, %v224_v0  ;;  %v226_v4 = vld [vmem:[#allocation2 + $0x78] sm:$0xf0]  ;;  %v216_v5 = vld [vmem:[#allocation2 + $0x60] sm:$0xf] }
   0x7   :  { %v243_v6 = vld [vmem:[#allocation2 + $0x64] sm:$0xf0]  ;;  %v229_v7 = vor.u32 %v244_v2, %v226_v4  ;;  %v242_v8 = vld [vmem:[#allocation2 + $0x64] sm:$0xf]  ;;  %v218_v9 = vld [vmem:[#allocation2 + $0x68] sm:$0xf0] }
   0x8   :  { %133 = vmatpush.bf16.msra.mxu0 %v225_v3  ;;  %v217_v10 = vor.u32 %v243_v6, %v216_v5  ;;  %v221_v11 = vor.u32 %v242_v8, %v218_v9  ;;  %v208_v12 = vld [vmem:[#allocation2 + $0x50] sm:$0xf]  ;;  %v241_v13 = vld [vmem:[#allocation2 + $0x54] sm:$0xf0]  ;;  %v240_v14 = vld [vmem:[#allocation2 + $0x54] sm:$0xf] }
   0x9   :  { %146 = vmatpush.bf16.msra.mxu1 %v229_v7  ;;  %v210_v15 = vld [vmem:[#allocation2 + $0x58] sm:$0xf0]  ;;  %v209_v16 = vor.u32 %v241_v13, %v208_v12  ;;  %v200_v18 = vld [vmem:[#allocation2 + $0x40] sm:$0xf]  ;;  %v239_v19 = vld [vmem:[#allocation2 + $0x44] sm:$0xf0] }
   0xa   :  { %v213_v17 = vor.u32 %v240_v14, %v210_v15  ;;  %v238_v20 = vld [vmem:[#allocation2 + $0x44] sm:$0xf]  ;;  %v202_v21 = vld [vmem:[#allocation2 + $0x48] sm:$0xf0]  ;;  %v201_v22 = vor.u32 %v239_v19, %v200_v18  ;;  %v192_v24 = vld [vmem:[#allocation2 + $0x30] sm:$0xf] }
   0xb   :  { %v205_v23 = vor.u32 %v238_v20, %v202_v21  ;;  %v237_v25 = vld [vmem:[#allocation2 + $0x34] sm:$0xf0]  ;;  %v236_v26 = vld [vmem:[#allocation2 + $0x34] sm:$0xf]  ;;  %v194_v27 = vld [vmem:[#allocation2 + $0x38] sm:$0xf0] }
   0xc   :  { %134 = vmatpush.bf16.msra.mxu0 %v217_v10  ;;  %v193_v28 = vor.u32 %v237_v25, %v192_v24  ;;  %v197_v29 = vor.u32 %v236_v26, %v194_v27  ;;  %v184_v30 = vld [vmem:[#allocation2 + $0x20] sm:$0xf]  ;;  %v235_v31 = vld [vmem:[#allocation2 + $0x24] sm:$0xf0]  ;;  %v234_v32 = vld [vmem:[#allocation2 + $0x24] sm:$0xf] }
   0xd   :  { %147 = vmatpush.bf16.msra.mxu1 %v221_v11  ;;  %v186_v33 = vld [vmem:[#allocation2 + $0x28] sm:$0xf0]  ;;  %v185_v34 = vor.u32 %v235_v31, %v184_v30  ;;  %v176_v36 = vld [vmem:[#allocation2 + $0x10] sm:$0xf]  ;;  %v233_v37 = vld [vmem:[#allocation2 + $0x14] sm:$0xf0] }
   0xe   :  { %v189_v35 = vor.u32 %v234_v32, %v186_v33  ;;  %v232_v38 = vld [vmem:[#allocation2 + $0x14] sm:$0xf]  ;;  %v178_v39 = vld [vmem:[#allocation2 + $0x18] sm:$0xf0]  ;;  %v177_v40 = vor.u32 %v233_v37, %v176_v36  ;;  %v168_v42 = vld [vmem:[#allocation2] sm:$0xf] }
   0xf   :  { %v181_v41 = vor.u32 %v232_v38, %v178_v39  ;;  %v231_v43 = vld [vmem:[#allocation2 + $0x4] sm:$0xf0]  ;;  %v230_v44 = vld [vmem:[#allocation2 + $0x4] sm:$0xf]  ;;  %v170_v45 = vld [vmem:[#allocation2 + $0x8] sm:$0xf0] }
  0x10   :  { %135 = vmatpush.bf16.msra.mxu0 %v209_v16  ;;  %v169_v46 = vor.u32 %v231_v43, %v168_v42  ;;  %v173_v47 = vor.u32 %v230_v44, %v170_v45  ;;  %v30_v48 = vld [vmem:[%s313_s0] sm:$0xf] }
  0x11   :  { %148 = vmatpush.bf16.msra.mxu1 %v213_v17  ;;  %v47_v49 = vld [vmem:[%s315_s2] sm:$0x3] }
  0x12   :  { %v49_v50 = vperm.slane %v47_v49, 0  ;;  %v50_v51 = vperm.slane %v47_v49, 1 }
  0x14   :  { %136 = vmatpush.bf16.msra.mxu0 %v201_v22 }
  0x15   :  { %149 = vmatpush.bf16.msra.mxu1 %v205_v23 }
  0x18   :  { %137 = vmatpush.bf16.msra.mxu0 %v193_v28 }
  0x19   :  { %150 = vmatpush.bf16.msra.mxu1 %v197_v29 }
  0x1c   :  { %138 = vmatpush.bf16.msra.mxu0 %v185_v34 }
  0x1d   :  { %151 = vmatpush.bf16.msra.mxu1 %v189_v35 }
  0x20   :  { %139 = vmatpush.bf16.msra.mxu0 %v177_v40 }
  0x21   :  { %152 = vmatpush.bf16.msra.mxu1 %v181_v41 }
  0x24   :  { %140 = vmatpush.bf16.msra.mxu0 %v169_v46 }
  0x25   :  { %153 = vmatpush.bf16.msra.mxu1 %v173_v47 }
  0x27   :  { %141 = vmatmul.bf16.vlgmr.msra.gmra.mxu0 %v30_v48 }
  0x28   :  { %154 = vmatmul.bf16.vlgmr.msra.gmra.mxu1 %v30_v48 }
  0xa4   :  { %v142_v52 = vpop.f32.mrf.mxu0 }
  0xa5   :  { %v143_v53 = vadd.f32 %v142_v52, %v49_v50  ;;  %v155_v54 = vpop.f32.mrf.mxu1 }
  0xa6   :  { %v156_v55 = vadd.f32 %v155_v54, %v50_v51 }
  0xa7   :  { %159 = vst [vmem:[%s316_s3] sm:$0xff] %v143_v53 }
  0xa8   :  { %160 = vst [vmem:[%s316_s3 + $0x8] sm:$0xff] %v156_v55 }
  0xac   :  { %v144_v56 = vpop.f32.mrf.mxu0 }
  0xad   :  { %v157_v57 = vpop.f32.mrf.mxu1 }
  0xae   :  { %165 = vsyncpa [#allocation3], 1 }

// kernel: conv_vae_forward.2
= control target key start
LH: loop header
LB: loop body
LE: loop exit
PB: predicated region body
PF: predicated region fallthrough
CT: control target
= control target key end

     0   :  { %13 = vsyncpa [#allocation4], 0  ;;  %s548_s0 = inlined_call_operand.vmem [shape: bf16[8,256], index: 0, kind: input, shape index: {}]   ;;  %s549_s1 = inlined_call_operand.hbm [shape: bf16[256,128], index: 1, kind: input, shape index: {}]   ;;  %s550_s2 = inlined_call_operand.vmem [shape: f32[1,128], index: 2, kind: input, shape index: {}]   ;;  %s551_s3 = inlined_call_operand.hbm [shape: f32[128,256], index: 3, kind: input, shape index: {}]   ;;  %s552_s4 = inlined_call_operand.vmem [shape: f32[1,256], index: 4, kind: input, shape index: {}]   ;;  %s553_s5 = inlined_call_operand.vmem [shape: f32[8,128], index: 5, kind: input, shape index: {}]   ;;  %s554_s6 = inlined_call_operand.vmem [shape: bf16[8,128], index: 6, kind: output, shape index: {0}]   ;;  %s555_s7 = inlined_call_operand.vmem [shape: f32[8,256], index: 7, kind: output, shape index: {1}]  }
   0x1   :  { %s21_s26 = sshll.u32 %s549_s1, 4  ;;  %s22_s26 = int_to_ptr.hbm [resolvable:$true] %s21_s26 }
   0x2   :  { %14 = vsyncpa [#allocation6], 0  ;;  %s475_s27 = smov [#allocation3]   ;;  %s36_s8 = sshll.u32 %s551_s3, 4  ;;  %s37_s8 = int_to_ptr.hbm [resolvable:$true] %s36_s8 }
   0x3   :  { %s23_s28 = sshll.u32 %s475_s27, 4  ;;  %s476_s9 = smov 64   ;;  %s24_s28 = int_to_ptr.vmem [resolvable:$true] %s23_s28 }
   0x4   :  { %s477_s10 = smov 4   ;;  %s478_s11 = smov [#allocation5]  }
   0x5   :  { %29 = dma.hbm_to_vmem [thread:$0]  %s22_s26, 2048, %s24_s28, [#allocation4], %s476_s9, %s476_s9, %s477_s10  }
   0x6   :  { %s38_s12 = sshll.u32 %s478_s11, 4  ;;  %s479_s13 = smov 256   ;;  %s39_s12 = int_to_ptr.vmem [resolvable:$true] %s38_s12 }
   0x7   :  { %s480_s14 = smov 16  }
   0x8   :  { %44 = dma.hbm_to_vmem [thread:$0]  %s37_s8, 4096, %s39_s12, [#allocation6], %s479_s13, %s479_s13, %s480_s14  }
   0x9   :  { %471 = dma.done.wait [#allocation4], 2048  }
   0xa   :  { %472 = vsyncadd [#allocation4], 4294965248 }
   0xb   :  { %473 = dma.done.wait [#allocation6], 4096  }
   0xc   :  { %474 = vsyncadd [#allocation6], 4294963200  ;;  %v405_v0 = vld [vmem:[#allocation3 + $0x38] sm:$0xff]  ;;  %v404_v2 = vld [vmem:[#allocation3 + $0x30] sm:$0xff] }
   0xd   :  { %v413_v1 = vld [vmem:[#allocation3 + $0x78] sm:$0xff]  ;;  %199 = vmatpush.bf16.msra.mxu0 %v405_v0  ;;  %v412_v3 = vld [vmem:[#allocation3 + $0x70] sm:$0xff]  ;;  %v403_v4 = vld [vmem:[#allocation3 + $0x28] sm:$0xff] }
   0xe   :  { %212 = vmatpush.bf16.msra.mxu1 %v413_v1  ;;  %v411_v5 = vld [vmem:[#allocation3 + $0x68] sm:$0xff]  ;;  %v266_v6 = vld [vmem:[#allocation5 + $0xf0] sm:$0xff]  ;;  %v267_v7 = vld [vmem:[#allocation5 + $0xf8] sm:$0xff] }
   0xf   :  { %v264_v8 = vld [vmem:[#allocation5 + $0xe0] sm:$0xff]  ;;  %v265_v9 = vld [vmem:[#allocation5 + $0xe8] sm:$0xff]  ;;  %274 = vmatpush.msra.mxu2 %v266_v6  ;;  %294 = vmatpush.msra.mxu3 %v267_v7  ;;  %v262_v10 = vld [vmem:[#allocation5 + $0xd0] sm:$0xff] }
  0x10   :  { %v263_v11 = vld [vmem:[#allocation5 + $0xd8] sm:$0xff]  ;;  %v402_v12 = vld [vmem:[#allocation3 + $0x20] sm:$0xff]  ;;  %v261_v15 = vld [vmem:[#allocation5 + $0xc8] sm:$0xff] }
  0x11   :  { %200 = vmatpush.bf16.msra.mxu0 %v404_v2  ;;  %275 = vmatpush.msra.mxu2 %v264_v8  ;;  %v410_v13 = vld [vmem:[#allocation3 + $0x60] sm:$0xff]  ;;  %v258_v16 = vld [vmem:[#allocation5 + $0xb0] sm:$0xff]  ;;  %v259_v17 = vld [vmem:[#allocation5 + $0xb8] sm:$0xff] }
  0x12   :  { %213 = vmatpush.bf16.msra.mxu1 %v412_v3  ;;  %295 = vmatpush.msra.mxu3 %v265_v9  ;;  %v260_v14 = vld [vmem:[#allocation5 + $0xc0] sm:$0xff]  ;;  %v401_v18 = vld [vmem:[#allocation3 + $0x18] sm:$0xff]  ;;  %v257_v21 = vld [vmem:[#allocation5 + $0xa8] sm:$0xff] }
  0x13   :  { %276 = vmatpush.msra.mxu2 %v262_v10  ;;  %v409_v19 = vld [vmem:[#allocation3 + $0x58] sm:$0xff]  ;;  %v256_v20 = vld [vmem:[#allocation5 + $0xa0] sm:$0xff]  ;;  %v254_v22 = vld [vmem:[#allocation5 + $0x90] sm:$0xff] }
  0x14   :  { %296 = vmatpush.msra.mxu3 %v263_v11  ;;  %v255_v23 = vld [vmem:[#allocation5 + $0x98] sm:$0xff]  ;;  %v400_v24 = vld [vmem:[#allocation3 + $0x10] sm:$0xff]  ;;  %v252_v26 = vld [vmem:[#allocation5 + $0x80] sm:$0xff] }
  0x15   :  { %201 = vmatpush.bf16.msra.mxu0 %v403_v4  ;;  %277 = vmatpush.msra.mxu2 %v260_v14  ;;  %v408_v25 = vld [vmem:[#allocation3 + $0x50] sm:$0xff]  ;;  %v253_v27 = vld [vmem:[#allocation5 + $0x88] sm:$0xff]  ;;  %v251_v29 = vld [vmem:[#allocation5 + $0x78] sm:$0xff] }
  0x16   :  { %214 = vmatpush.bf16.msra.mxu1 %v411_v5  ;;  %297 = vmatpush.msra.mxu3 %v261_v15  ;;  %v250_v28 = vld [vmem:[#allocation5 + $0x70] sm:$0xff]  ;;  %v399_v30 = vld [vmem:[#allocation3 + $0x8] sm:$0xff]  ;;  %v63_v32 = vld [vmem:[%s548_s0] sm:$0xff] }
  0x17   :  { %278 = vmatpush.msra.mxu2 %v258_v16  ;;  %v407_v31 = vld [vmem:[#allocation3 + $0x48] sm:$0xff]  ;;  %v248_v33 = vld [vmem:[#allocation5 + $0x60] sm:$0xff]  ;;  %v246_v35 = vld [vmem:[#allocation5 + $0x50] sm:$0xff]  ;;  %v97_v38 = vunpack.c.l.b16 %v63_v32  ;;  %v98_v39 = vunpack.c.h.b16 %v63_v32 }
  0x18   :  { %298 = vmatpush.msra.mxu3 %v259_v17  ;;  %v249_v34 = vld [vmem:[#allocation5 + $0x68] sm:$0xff]  ;;  %v247_v36 = vld [vmem:[#allocation5 + $0x58] sm:$0xff]  ;;  %v398_v37 = vld [vmem:[#allocation3] sm:$0xff] }
  0x19   :  { %202 = vmatpush.bf16.msra.mxu0 %v402_v12  ;;  %279 = vmatpush.msra.mxu2 %v256_v20  ;;  %v406_v40 = vld [vmem:[#allocation3 + $0x40] sm:$0xff]  ;;  %v245_v42 = vld [vmem:[#allocation5 + $0x48] sm:$0xff]  ;;  %v242_v43 = vld [vmem:[#allocation5 + $0x30] sm:$0xff]  ;;  %v99_v45 = vpack.c.b16 %v97_v38, %v97_v38  ;;  %v100_v46 = vpack.c.b16 %v98_v39, %v98_v39 }
  0x1a   :  { %215 = vmatpush.bf16.msra.mxu1 %v410_v13  ;;  %299 = vmatpush.msra.mxu3 %v257_v21  ;;  %v244_v41 = vld [vmem:[#allocation5 + $0x40] sm:$0xff]  ;;  %v243_v44 = vld [vmem:[#allocation5 + $0x38] sm:$0xff]  ;;  %v241_v48 = vld [vmem:[#allocation5 + $0x28] sm:$0xff] }
  0x1b   :  { %280 = vmatpush.msra.mxu2 %v254_v22  ;;  %v240_v47 = vld [vmem:[#allocation5 + $0x20] sm:$0xff]  ;;  %v238_v49 = vld [vmem:[#allocation5 + $0x10] sm:$0xff]  ;;  %v239_v50 = vld [vmem:[#allocation5 + $0x18] sm:$0xff] }
  0x1c   :  { %300 = vmatpush.msra.mxu3 %v255_v23  ;;  %v236_v51 = vld [vmem:[#allocation5] sm:$0xff]  ;;  %v237_v52 = vld [vmem:[#allocation5 + $0x8] sm:$0xff] }
  0x1d   :  { %203 = vmatpush.bf16.msra.mxu0 %v401_v18  ;;  %281 = vmatpush.msra.mxu2 %v252_v26  ;;  %v420_v53 = vld [vmem:[%s550_s2] ss:$0 sm:$0xff] }
  0x1e   :  { %216 = vmatpush.bf16.msra.mxu1 %v409_v19  ;;  %301 = vmatpush.msra.mxu3 %v253_v27  ;;  %v268_v60 = vld [vmem:[%s552_s4] sm:$0x3] }
  0x1f   :  { %282 = vmatpush.msra.mxu2 %v250_v28  ;;  %v270_v61 = vperm.slane %v268_v60, 0  ;;  %v271_v62 = vperm.slane %v268_v60, 1  ;;  %v314_v5 = vld [vmem:[%s553_s5] sm:$0xff] }
  0x20   :  { %302 = vmatpush.msra.mxu3 %v251_v29 }
  0x21   :  { %204 = vmatpush.bf16.msra.mxu0 %v400_v24  ;;  %283 = vmatpush.msra.mxu2 %v248_v33 }
  0x22   :  { %217 = vmatpush.bf16.msra.mxu1 %v408_v25  ;;  %303 = vmatpush.msra.mxu3 %v249_v34 }
  0x23   :  { %284 = vmatpush.msra.mxu2 %v246_v35 }
  0x24   :  { %304 = vmatpush.msra.mxu3 %v247_v36 }
  0x25   :  { %205 = vmatpush.bf16.msra.mxu0 %v399_v30  ;;  %285 = vmatpush.msra.mxu2 %v244_v41 }
  0x26   :  { %218 = vmatpush.bf16.msra.mxu1 %v407_v31  ;;  %305 = vmatpush.msra.mxu3 %v245_v42 }
  0x27   :  { %286 = vmatpush.msra.mxu2 %v242_v43 }
  0x28   :  { %306 = vmatpush.msra.mxu3 %v243_v44 }
  0x29   :  { %206 = vmatpush.bf16.msra.mxu0 %v398_v37  ;;  %287 = vmatpush.msra.mxu2 %v240_v47 }
  0x2a   :  { %219 = vmatpush.bf16.msra.mxu1 %v406_v40  ;;  %307 = vmatpush.msra.mxu3 %v241_v48 }
  0x2b   :  { %288 = vmatpush.msra.mxu2 %v238_v49 }
  0x2c   :  { %207 = vmatmul.bf16.vlgmr.msra.gmra.mxu0 %v99_v45  ;;  %308 = vmatpush.msra.mxu3 %v239_v50 }
  0x2d   :  { %220 = vmatmul.bf16.vlgmr.msra.gmra.mxu1 %v100_v46  ;;  %289 = vmatpush.msra.mxu2 %v236_v51 }
  0x2e   :  { %309 = vmatpush.msra.mxu3 %v237_v52 }
  0xa9   :  { %v208_v54 = vpop.f32.mrf.mxu0 }
  0xaa   :  { %v221_v55 = vpop.f32.mrf.mxu1 }
  0xab   :  { %v222_v56 = vadd.f32 %v221_v55, %v208_v54 }
  0xad   :  { %v235_v57 = vadd.f32 %v420_v53, %v222_v56 }
  0xaf   :  { %290 = vmatmul.f32.vlgmr.msra.gmra.mxu2 %v235_v57  ;;  %310 = vmatmul.f32.vlgmr.msra.gmra.mxu3 %v235_v57 }
  0xb1   :  { %v210_v58 = vpop.f32.mrf.mxu0 }
  0xb2   :  { %v223_v59 = vpop.f32.mrf.mxu1 }
 0x132   :  { %v291_v63 = vpop.f32.mrf.mxu2  ;;  %v311_v0 = vpop.f32.mrf.mxu3 }
 0x133   :  { %v292_v1 = vadd.f32 %v291_v63, %v270_v61  ;;  %v312_v2 = vadd.f32 %v311_v0, %v271_v62 }
 0x135   :  { %322 = vst [vmem:[%s555_s7] sm:$0xff] %v292_v1  ;;  %v315_v3 = vmul.f32 0.5, %v312_v2 }
 0x136   :  { %323 = vst [vmem:[%s555_s7 + $0x8] sm:$0xff] %v312_v2 }
 0x137   :  { %v316_v4 = vmul.f32 1.442695, %v315_v3 }
 0x139   :  { %421 = vpow2.f32 %v316_v4 }
 0x13f   :  { %v422_v6 = vpop.eup %421 }
 0x140   :  { %v318_v7 = vmul.f32 %v422_v6, %v314_v5 }
 0x142   :  { %v319_v8 = vadd.f32 %v318_v7, %v292_v1 }
 0x144   :  { %v320_v9 = vpack.c.bf16 %v319_v8, %v319_v8 }
 0x146   :  { %321 = vst [vmem:[%s554_s6] sm:$0xf] %v320_v9 }
 0x147   :  { %332 = vsyncpa [#allocation4], 1 }
 0x148   :  { %333 = vsyncpa [#allocation6], 1 }

</bundles_post_ra>
